<compile_context>
chip_gen: v7x
topology: tpu7x:2x2x1
jax: 0.10.0
libtpu: 0.0.40
codegen_flags: <defaults>
</compile_context>

<pallas_src>
import jax
import jax.numpy as jnp
from jax.experimental import pallas as pl
from jax.experimental.pallas import tpu as pltpu


def _linear_kernel(x_ref, w_ref, o_ref):
    # x_ref: (TM, D) tile, w_ref: (1, D) resident weight row, o_ref: (TM, 1).
    # VPU elementwise multiply (broadcast over rows) + XLU lane reduction;
    # accumulate in f32 regardless of input dtype.
    prod = x_ref[...].astype(jnp.float32) * w_ref[...].astype(jnp.float32)
    o_ref[...] = jnp.sum(prod, axis=-1, keepdims=True).astype(o_ref.dtype)


def _choose_batch_tile(B, D, itemsize):
    """Pick a batch tile: ~2 MiB of x per tile, multiple of 8, capped at 1024."""
    bytes_per_row = max(1, D * itemsize)
    tm = (2 * 1024 * 1024) // bytes_per_row
    tm = max(8, min(1024, tm))
    tm = max(8, (tm // 8) * 8)
    if B <= tm:
        # Single tile: round B up to a sublane multiple.
        tm = max(8, ((B + 7) // 8) * 8)
    return tm


def simple_linear_forward(x, w):
    """x: (B, D), w: (1, D) (PyTorch nn.Linear weight layout) -> (B,)."""
    B, D = x.shape
    assert w.shape == (1, D), f"expected weight shape (1, {D}), got {w.shape}"

    itemsize = jnp.dtype(x.dtype).itemsize
    tm = _choose_batch_tile(B, D, itemsize)
    num_tiles = pl.cdiv(B, tm)
    b_pad = num_tiles * tm
    if b_pad != B:
        # Zero-pad the batch; padded rows produce zeros and are sliced off.
        x = jnp.pad(x, ((0, b_pad - B), (0, 0)))

    cost = pl.CostEstimate(
        flops=2 * b_pad * D,
        transcendentals=0,
        bytes_accessed=itemsize * (b_pad * D + D) + 4 * b_pad,
    )

    out = pl.pallas_call(
        _linear_kernel,
        out_shape=jax.ShapeDtypeStruct((b_pad, 1), x.dtype),
        grid_spec=pltpu.PrefetchScalarGridSpec(
            num_scalar_prefetch=0,
            grid=(num_tiles,),
            in_specs=[
                pl.BlockSpec((tm, D), lambda i: (i, 0)),   # streamed x tiles
                pl.BlockSpec((1, D), lambda i: (0, 0)),    # resident weight row
            ],
            out_specs=pl.BlockSpec((tm, 1), lambda i: (i, 0)),
        ),
        compiler_params=pltpu.CompilerParams(
            dimension_semantics=("parallel",),
        ),
        cost_estimate=cost,
    )(x, w)

    # .view(-1) in the PyTorch module (drop any batch padding).
    return out.reshape(-1)[:B]


if __name__ == "__main__":
    key = jax.random.PRNGKey(0)

    # --- small shape consistent with the module: batch=8, input_size=32 ---
    B, D = 8, 32
    kx, kw, kx2 = jax.random.split(key, 3)
    x = jax.random.normal(kx, (B, D), dtype=jnp.float32)

    # torch.nn.Linear default init: uniform in [-1/sqrt(D), 1/sqrt(D)],
    # weight shape (1, D) kept as-is (lane-dense).
    bound = 1.0 / jnp.sqrt(jnp.float32(D))
    w = jax.random.uniform(kw, (1, D), dtype=jnp.float32, minval=-bound, maxval=bound)

    y = simple_linear_forward(x, w)
    jax.block_until_ready(y)

    y_ref = (x @ w.T).reshape(-1)
    assert y.shape == (B,)
    assert jnp.allclose(y, y_ref, atol=1e-5, rtol=1e-5)

    # --- exercise the multi-tile + padding path (B not a multiple of TM) ---
    B2, D2 = 2050, 256
    x2 = jax.random.normal(kx2, (B2, D2), dtype=jnp.float32)
    w2 = jax.random.uniform(kw, (1, D2), dtype=jnp.float32,
                            minval=-bound, maxval=bound)
    y2 = simple_linear_forward(x2, w2)
    jax.block_until_ready(y2)
    y2_ref = (x2 @ w2.T).reshape(-1)
    assert y2.shape == (B2,)
    assert jnp.allclose(y2, y2_ref, atol=1e-4, rtol=1e-4)

    print("KERNEL_OK")
</pallas_src>

<mosaic_0001>
module attributes {stable_mosaic.version = 11 : i64} {
  func.func @_linear_kernel(%arg0: i32, %arg1: memref<8x32xf32, #tpu.memory_space<vmem>>, %arg2: memref<1x32xf32, #tpu.memory_space<vmem>>, %arg3: memref<8x1xf32, #tpu.memory_space<vmem>>) attributes {dimension_semantics = [#tpu.dimension_semantics<parallel>], iteration_bounds = array<i64: 1>, scalar_prefetch = 0 : i64, scratch_operands = 0 : i64, tpu.core_type = #tpu.core_type<tc>, window_params = [{transform_indices = @transform_0, window_bounds = array<i64: 8, 32>}, {pipeline_mode = #tpu.pipeline_mode<synchronous>, transform_indices = @transform_1, window_bounds = array<i64: 1, 32>}, {transform_indices = @transform_2, window_bounds = array<i64: 8, 1>}]} {
    %c0 = arith.constant 0 : index
    %c0_0 = arith.constant 0 : index
    %0 = vector.load %arg1[%c0, %c0_0] : memref<8x32xf32, #tpu.memory_space<vmem>>, vector<8x32xf32>
    %c0_1 = arith.constant 0 : index
    %c0_2 = arith.constant 0 : index
    %1 = vector.load %arg2[%c0_1, %c0_2] : memref<1x32xf32, #tpu.memory_space<vmem>>, vector<1x32xf32>
    %2 = vector.broadcast %1 : vector<1x32xf32> to vector<8x32xf32>
    %3 = arith.mulf %0, %2 : vector<8x32xf32>
    %cst = arith.constant dense<0.000000e+00> : vector<8xf32>
    %4 = vector.multi_reduction <add>, %3, %cst [1] : vector<8x32xf32> to vector<8xf32>
    %5 = vector.shape_cast %4 : vector<8xf32> to vector<8x1xf32>
    %c0_3 = arith.constant 0 : index
    %c0_4 = arith.constant 0 : index
    %6 = vector.load %arg3[%c0_3, %c0_4] : memref<8x1xf32, #tpu.memory_space<vmem>>, vector<8x1xf32>
    tpu.vector_store %arg3[%c0_3, %c0_4], %5 {strides = array<i32>} : memref<8x1xf32, #tpu.memory_space<vmem>>, vector<8x1xf32>,
    return
  }
  func.func @transform_0(%arg0: i32) -> (i32, i32) {
    %c0_i32 = arith.constant 0 : i32
    %c0_i32_0 = arith.constant 0 : i32
    return %arg0, %c0_i32 : i32, i32
  }
  func.func @transform_1(%arg0: i32) -> (i32, i32) {
    %c0_i32 = arith.constant 0 : i32
    %c0_i32_0 = arith.constant 0 : i32
    %c0_i32_1 = arith.constant 0 : i32
    return %c0_i32, %c0_i32_0 : i32, i32
  }
  func.func @transform_2(%arg0: i32) -> (i32, i32) {
    %c0_i32 = arith.constant 0 : i32
    %c0_i32_0 = arith.constant 0 : i32
    return %arg0, %c0_i32 : i32, i32
  }
}

</mosaic_0001>

<bundles_post_ra>
// kernel: tpu_custom_call.1
= control target key start
LH: loop header
LB: loop body
LE: loop exit
PB: predicated region body
PF: predicated region fallthrough
CT: control target
= control target key end

     0   :  { %7 = vsyncpa [#allocation3], 0  ;;  %s69_s9 = smov [#allocation2]   ;;  %s103_s0 = inlined_call_operand.hbm [shape: f32[8,32], index: 0, kind: input, shape index: {}]   ;;  %s104_s1 = inlined_call_operand.vmem [shape: f32[1,32], index: 1, kind: input, shape index: {}]   ;;  %s105_s2 = inlined_call_operand.vmem [shape: f32[8,1], index: 2, kind: output, shape index: {}]  }
   0x1   :  { %s14_s10 = sshll.u32 %s69_s9, 4  ;;  %s45_s13 = scalar_lea.hbm %s103_s0, 128  ;;  %s15_s10 = int_to_ptr.vmem [resolvable:$true] %s14_s10 }
   0x2   :  { %p46_p0 = scmp.ne.s32.totalorder %s103_s0, %s45_s13  ;;  %p49_p1 = scmp.lt.u32.totalorder %s45_s13, %s103_s0 }
   0x4   :  { %p51_p2 = pnand %p49_p1, %p46_p0 }
   0x6   :  { %54 = shalt.err (!%p51_p2)
}
   0x7   :  { %s55_s18 = scalar_lea.vmem %s15_s10, 128  ;;  %p60_p4 = scmp.lt.s32.totalorder %s15_s10, %s15_s10 }
   0x8   :  { %p56_p3 = scmp.ne.s32.totalorder %s15_s10, %s55_s18  ;;  %p61_p5 = scmp.lt.s32.totalorder %s55_s18, %s55_s18 }
   0xa   :  { %p62_p6 = por %p61_p5, %p60_p4 }
   0xc   :  { %p63_p7 = pnand %p62_p6, %p56_p3 }
   0xe   :  { %66 = shalt.err (!%p63_p7)
}
   0xf   :  { %17 = dma.hbm_to_vmem [thread:$0]  %s103_s0, 128, %s15_s10, [#allocation3]  }
  0x10   :  { %67 = dma.done.wait [#allocation3], 128  }
  0x11   :  { %68 = vsyncadd [#allocation3], 4294967168  ;;  %v23_v0 = vld [vmem:[#allocation2] sm:$0xff]  ;;  %vm32_vm0 = vcmask 261120   ;;  %vm36_vm1 = vcmask 7168  }
  0x12   :  { %v43_v1 = vld [vmem:[%s104_s1] ss:$0 sm:$0xff] }
  0x13   :  { %v31_v2 = vmul.f32 %v43_v1, %v23_v0 }
  0x15   :  { %v33_v3 = vsel %vm32_vm0, %v31_v2, 0.0 }
  0x16   :  { %34 = vadd.xlane.f32.xlu0 %v33_v3 }
  0xa3   :  { %v35_v4 = vpop.xlane.xlu0 %34 }
  0xa4   :  { %37 = vst.msk [vmem:[%s105_s2] sm:$0xff] %vm36_vm1, %v35_v4 }
  0xa5   :  { %42 = vsyncpa [#allocation3], 1 }

</bundles_post_ra>
